<compile_context>
chip_gen: v6e
topology: v6e:2x2x1
jax: 0.10.0
libtpu: 0.0.40
codegen_flags: <defaults>
</compile_context>

<pallas_src>
import numpy as np

import jax
import jax.numpy as jnp
from jax.experimental import pallas as pl
from jax.experimental.pallas import tpu as pltpu


_GROUP = 128              # lane-group width for static column skipping
_TILE_TARGET = 4 << 20    # ~4 MiB per x tile (2x in + 2x out buffers ~ 16 MiB)
_MIN_TILE = 512 << 10     # don't shrink tiles below this just to add steps
_VMEM_FLOOR = 16 << 20    # raise v5e's 16 MiB scoped default explicitly
_VMEM_CEIL = 48 << 20     # stay safely under v7x's 64 MiB physical VMEM


def _build_pos_idx(col_types):
    """Replicates MixedActivation.__init__ index bookkeeping."""
    pos = []
    c = 0
    for spec in col_types:
        if spec == 'pos':
            pos.append(c)
            c += 1
        elif isinstance(spec, int):
            c += spec
        else:
            c += 1
    return pos, c


def _round_up(v, m):
    return -(-v // m) * m


def _choose_tile_n(n, row_bytes):
    """Batch tile: ~4 MiB, multiple of 32 rows (covers f32/bf16/int8 sublane
    packing), and — as long as tiles stay >= ~512 KiB — at least 2-8 grid
    steps so the DMA pipeline and v7x's two TensorCores are engaged."""
    if n <= 32:
        return n
    rows = max(32, (_TILE_TARGET // max(1, row_bytes)) // 32 * 32)
    for steps in (8, 4, 2):
        cap = _round_up(pl.cdiv(n, steps), 32)
        if cap * row_bytes >= _MIN_TILE or steps == 2:
            rows = min(rows, cap)
            break
    return min(rows, n)


def _choose_col_block(c, itemsize):
    """Lane-axis block: full C unless even a 32-row tile would blow past the
    tile budget, in which case split C into multiples of 128."""
    if c % 128 != 0 or 32 * c * itemsize <= _TILE_TARGET:
        return c
    cols = max(128, (_TILE_TARGET // (32 * itemsize)) // 128 * 128)
    return min(cols, c)


def _compiler_params(tile_n, col_block, itemsize, semantics):
    buf_bytes = 4 * tile_n * col_block * itemsize   # 2x in + 2x out buffers
    buf_bytes += 2 * col_block * 4                  # mask double buffer (f32)
    vmem_limit = int(min(max(buf_bytes + (4 << 20), _VMEM_FLOOR), _VMEM_CEIL))
    return pltpu.CompilerParams(dimension_semantics=semantics,
                                vmem_limit_bytes=vmem_limit)


def _kernel(x_ref, mask_ref, o_ref):
    x = x_ref[...]                      # (tile_n, col_block)
    m = mask_ref[...]                   # (1, col_block), broadcasts over rows
    # Bit-exact with `out[:, pos] = relu(out[:, pos])` (NaN / -0.0 identical).
    o_ref[...] = jnp.where(m > 0, jnp.maximum(x, 0), x)


def _kernel_prefetch(gid_ref, x_ref, mask_ref, o_ref):
    del gid_ref                         # consumed only by the index_maps
    _kernel(x_ref, mask_ref, o_ref)


def _dense_call(x, mask):
    """Process every column: grid over (row tiles, lane blocks)."""
    N, C = x.shape
    itemsize = jnp.dtype(x.dtype).itemsize
    col_block = _choose_col_block(C, itemsize)
    tile_n = _choose_tile_n(N, col_block * itemsize)
    grid = (pl.cdiv(N, tile_n), pl.cdiv(C, col_block))
    return pl.pallas_call(
        _kernel,
        out_shape=jax.ShapeDtypeStruct((N, C), x.dtype),
        grid=grid,
        in_specs=[
            pl.BlockSpec((tile_n, col_block), lambda i, j: (i, j)),
            pl.BlockSpec((1, col_block), lambda i, j: (0, j)),
        ],
        out_specs=pl.BlockSpec((tile_n, col_block), lambda i, j: (i, j)),
        compiler_params=_compiler_params(tile_n, col_block, itemsize,
                                         ("parallel", "arbitrary")),
    )(x, mask)


def _sparse_call(x, mask, touched_groups):
    """Column-group-skipping path: only 128-lane groups containing a 'pos'
    column are DMA'd / rewritten; all other groups pass through via the
    input->output alias."""
    N, C = x.shape
    itemsize = jnp.dtype(x.dtype).itemsize
    tile_n = _choose_tile_n(N, _GROUP * itemsize)
    gids = jnp.asarray(touched_groups, dtype=jnp.int32)
    grid = (pl.cdiv(N, tile_n), len(touched_groups))
    return pl.pallas_call(
        _kernel_prefetch,
        out_shape=jax.ShapeDtypeStruct((N, C), x.dtype),
        grid_spec=pltpu.PrefetchScalarGridSpec(
            num_scalar_prefetch=1,
            grid=grid,
            in_specs=[
                pl.BlockSpec((tile_n, _GROUP), lambda i, g, gid: (i, gid[g])),
                pl.BlockSpec((1, _GROUP), lambda i, g, gid: (0, gid[g])),
            ],
            out_specs=pl.BlockSpec((tile_n, _GROUP),
                                   lambda i, g, gid: (i, gid[g])),
        ),
        # Alias x -> out: column groups the grid never visits keep their input
        # values, and HBM footprint is halved when x is dead / donatable.
        # Input index 1 accounts for the scalar-prefetch operand at index 0.
        input_output_aliases={1: 0},
        compiler_params=_compiler_params(tile_n, _GROUP, itemsize,
                                         ("parallel", "arbitrary")),
    )(gids, x, mask)


def mixed_activation(x, col_types):
    """Forward pass of MixedActivation using Pallas TPU kernels.

    x: jnp array of shape [N, C], float dtype.
    """
    pos, total = _build_pos_idx(col_types)
    N, C = x.shape
    assert C == total, f"x has {C} features but col_types imply {total}"

    if len(pos) == 0:
        # Matches `if self.pos_idx.numel() == 0: return x`
        return x

    # Host-side constant mask: folded by XLA, no runtime scatter.
    mask_np = np.zeros((1, C), dtype=np.float32)
    mask_np[0, np.asarray(pos, dtype=np.int64)] = 1.0
    mask = jnp.asarray(mask_np)

    # Tiny / narrow-and-ragged feature axes: a masked-vst kernel wastes lane
    # bandwidth — let XLA fuse the elementwise op instead.
    if C < 128 or (C % 128 != 0 and C < 512):
        return jnp.where(mask > 0, jnp.maximum(x, 0), x)

    if C % 128 == 0:
        n_groups = C // _GROUP
        touched = sorted({p // _GROUP for p in pos})
        # Skipping only pays when a real fraction of lane groups is untouched;
        # otherwise scattered 128-lane DMAs just add overhead.
        if n_groups >= 2 and 2 * len(touched) <= n_groups:
            return _sparse_call(x, mask, touched)

    return _dense_call(x, mask)


def _reference(x, col_types):
    """Pure-JAX reference mirroring the PyTorch forward."""
    pos, _ = _build_pos_idx(col_types)
    if len(pos) == 0:
        return x
    idx = jnp.asarray(pos, dtype=jnp.int32)
    return x.at[:, idx].set(jnp.maximum(x[:, idx], 0.0))


if __name__ == "__main__":
    key = jax.random.PRNGKey(0)
    k1, k2, k3, k4 = jax.random.split(key, 4)

    # 1) Sparse column-group-skipping path: C = 512 (4 lane groups), 'pos'
    #    columns only inside groups 0 and 2.
    col_types_sparse = ['pos', 127, 128, 'pos', 'pos', 126, 128]
    _, c_sparse = _build_pos_idx(col_types_sparse)
    assert c_sparse == 512
    x1 = jax.random.normal(k1, (64, c_sparse), dtype=jnp.float32)
    y1 = jax.block_until_ready(mixed_activation(x1, col_types_sparse))
    assert y1.shape == x1.shape and y1.dtype == x1.dtype
    assert jnp.array_equal(y1, _reference(x1, col_types_sparse)), \
        "sparse path mismatch vs reference"

    # 2) Dense lane-aligned path (every group touched): C = 256, ragged N.
    col_types_dense = ['pos', 126, 'pos', 'cat', 126, 'pos']
    _, c_dense = _build_pos_idx(col_types_dense)
    assert c_dense == 256
    x2 = jax.random.normal(k2, (48, c_dense), dtype=jnp.float32)
    y2 = jax.block_until_ready(mixed_activation(x2, col_types_dense))
    assert jnp.array_equal(y2, _reference(x2, col_types_dense)), \
        "dense path mismatch vs reference"

    # 3) Dense ragged-C path (C >= 512, not a multiple of 128): full-C block.
    col_types_ragged = ['pos', 255, 'pos', 262, 'pos']
    _, c_ragged = _build_pos_idx(col_types_ragged)
    assert c_ragged == 520
    x3 = jax.random.normal(k3, (40, c_ragged), dtype=jnp.float32)
    y3 = jax.block_until_ready(mixed_activation(x3, col_types_ragged))
    assert jnp.array_equal(y3, _reference(x3, col_types_ragged)), \
        "ragged-C path mismatch vs reference"

    # 4) Tiny tabular C: XLA-fusion fallback.
    col_types_small = ['pos', 3, 'cat', 'pos', 2]
    _, c_small = _build_pos_idx(col_types_small)
    x4 = jax.random.normal(k4, (8, c_small), dtype=jnp.float32)
    y4 = jax.block_until_ready(mixed_activation(x4, col_types_small))
    assert jnp.array_equal(y4, _reference(x4, col_types_small)), \
        "fallback path mismatch vs reference"

    # 5) No 'pos' columns -> identity pass-through.
    assert mixed_activation(x4, [3, 'cat', 4]) is x4

    print("KERNEL_OK")
</pallas_src>

<mosaic_0001>
module attributes {stable_mosaic.version = 11 : i64} {
  func.func @_kernel_prefetch(%arg0: i32, %arg1: i32, %arg2: memref<2xi32, #tpu.memory_space<smem>>, %arg3: memref<32x128xf32, #tpu.memory_space<vmem>>, %arg4: memref<1x128xf32, #tpu.memory_space<vmem>>, %arg5: memref<32x128xf32, #tpu.memory_space<vmem>>) attributes {dimension_semantics = [#tpu.dimension_semantics<parallel>, #tpu.dimension_semantics<arbitrary>], iteration_bounds = array<i64: 2, 2>, scalar_prefetch = 1 : i64, scratch_operands = 0 : i64, tpu.core_type = #tpu.core_type<tc>, window_params = [{transform_indices = @transform_0, window_bounds = array<i64: 32, 128>}, {transform_indices = @transform_1, window_bounds = array<i64: 1, 128>}, {transform_indices = @transform_2, window_bounds = array<i64: 32, 128>}]} {
    %c0 = arith.constant 0 : index
    %c0_0 = arith.constant 0 : index
    %0 = vector.load %arg3[%c0, %c0_0] : memref<32x128xf32, #tpu.memory_space<vmem>>, vector<32x128xf32>
    %c0_1 = arith.constant 0 : index
    %c0_2 = arith.constant 0 : index
    %1 = vector.load %arg4[%c0_1, %c0_2] : memref<1x128xf32, #tpu.memory_space<vmem>>, vector<1x128xf32>
    %cst = arith.constant 0.000000e+00 : f32
    %2 = vector.broadcast %cst : f32 to vector<1x128xf32>
    %3 = arith.cmpf ogt, %1, %2 : vector<1x128xf32>
    %cst_3 = arith.constant 0.000000e+00 : f32
    %4 = vector.broadcast %cst_3 : f32 to vector<32x128xf32>
    %5 = arith.maximumf %0, %4 : vector<32x128xf32>
    %6 = vector.shape_cast %3 : vector<1x128xi1> to vector<1x128xi1>
    %7 = vector.broadcast %6 : vector<1x128xi1> to vector<32x128xi1>
    %8 = arith.select %7, %5, %0 : vector<32x128xi1>, vector<32x128xf32>
    %c0_4 = arith.constant 0 : index
    %c0_5 = arith.constant 0 : index
    %9 = vector.load %arg5[%c0_4, %c0_5] : memref<32x128xf32, #tpu.memory_space<vmem>>, vector<32x128xf32>
    tpu.vector_store %arg5[%c0_4, %c0_5], %8 {strides = array<i32>} : memref<32x128xf32, #tpu.memory_space<vmem>>, vector<32x128xf32>,
    return
  }
  func.func @transform_0(%arg0: i32, %arg1: i32, %arg2: memref<2xi32, #tpu.memory_space<smem>>) -> (i32, i32) {
    %0 = arith.index_cast %arg1 : i32 to index
    %1 = memref.load %arg2[%0] : memref<2xi32, #tpu.memory_space<smem>>
    %c0_i32 = arith.constant 0 : i32
    return %arg0, %1 : i32, i32
  }
  func.func @transform_1(%arg0: i32, %arg1: i32, %arg2: memref<2xi32, #tpu.memory_space<smem>>) -> (i32, i32) {
    %0 = arith.index_cast %arg1 : i32 to index
    %1 = memref.load %arg2[%0] : memref<2xi32, #tpu.memory_space<smem>>
    %c0_i32 = arith.constant 0 : i32
    %c0_i32_0 = arith.constant 0 : i32
    return %c0_i32, %1 : i32, i32
  }
  func.func @transform_2(%arg0: i32, %arg1: i32, %arg2: memref<2xi32, #tpu.memory_space<smem>>) -> (i32, i32) {
    %0 = arith.index_cast %arg1 : i32 to index
    %1 = memref.load %arg2[%0] : memref<2xi32, #tpu.memory_space<smem>>
    %c0_i32 = arith.constant 0 : i32
    return %arg0, %1 : i32, i32
  }
}

</mosaic_0001>

<bundles_post_ra>
// kernel: tpu_custom_call.1
= control target key start
LH: loop header
LB: loop body
LE: loop exit
PB: predicated region body
PF: predicated region fallthrough
CT: control target
= control target key end

     0   :  { %s919_s0 = inlined_call_operand.vmem [shape: s32[2], index: 0, kind: input, shape index: {}]   ;;  %s920_s1 = inlined_call_operand.hbm [shape: f32[64,512], index: 1, kind: input, shape index: {}, may-alias: {1,3}]   ;;  %s921_s2 = inlined_call_operand.vmem [shape: f32[1,512], index: 2, kind: input, shape index: {}]   ;;  %s922_s3 = inlined_call_operand.hbm [shape: f32[64,512], index: 3, kind: output, shape index: {}, may-alias: {1,3}]  }
   0x1   :  { %s8_s14 = sshll.u32 %s919_s0, 4  ;;  %s9_s14 = int_to_ptr.vmem [resolvable:$true] %s8_s14 }
   0x2   :  { %s490_s15 = scalar_lea.vmem %s9_s14, 16  ;;  %p495_p1 = scmp.lt.s32.totalorder %s9_s14, %s9_s14 }
   0x3   :  { %p491_p0 = scmp.ne.s32.totalorder %s9_s14, %s490_s15  ;;  %p496_p2 = scmp.lt.s32.totalorder %s490_s15, %s490_s15 }
   0x5   :  { %p497_p3 = por %p496_p2, %p495_p1 }
   0x7   :  { %p498_p4 = pnand %p497_p3, %p491_p0 }
   0x9   :  { %501 = shalt.err (!%p498_p4)  }
   0xa   :  { %s654_s16 = smov [#allocation3]  }
   0xb   :  { %11 = dma.vmem_to_smem %s9_s14, 16, %s654_s16, [#allocation2] }
   0xc   :  { %600 = dma.done.wait [#allocation2], 16 }
   0xd   :  { %601 = vsyncadd [#allocation2], 4294967280 }
   0xe   :  { %13 = sfence }
   0xf   :  { %14 = vsyncpa [#allocation5], 0 }
  0x10   :  { %16 = vsyncpa [#allocation5 + $0x1], 0 }
  0x11   :  { %17 = vsyncpa [#allocation6], 0 }
  0x12   :  { %19 = vsyncpa [#allocation6 + $0x1], 0  ;;  %s687_s17 = smov 0   ;;  %s689_s0 = smov 0  }
  0x13   :  { %s691_s18 = smov 0   ;;  %s693_s19 = smov 0  }
  0x14   :  { %s695_s20 = smov 0   ;;  %s697_s21 = smov 0  }
  0x15   :  { %s699_s22 = smov 0   ;;  %s701_s23 = smov 0  }
  0x16   :  { %s703_s24 = smov 0   ;;  %s705_s25 = smov 0  }
  0x17   :  { %s707_s26 = smov 0  }
  0x18 LB: > { %928 = sst [smem:[#allocation14_spill]] %s644_s24  ;;  %s355_s27 = sadd.s32 4294967295, %s652_s26   ;;  %s652_s26 = sphi %s707_s26, %s25_s26   ;;  %s648_s25 = sphi %s705_s25, %s952_s25   ;;  %s644_s24 = sphi %s703_s24, %s943_s24   ;;  %s640_s23 = sphi %s701_s23, %s951_s23   ;;  %s636_s22 = sphi %s699_s22, %s942_s22   ;;  %s632_s21 = sphi %s697_s21, %s950_s21   ;;  %s628_s20 = sphi %s695_s20, %s949_s20   ;;  %s624_s19 = sphi %s693_s19, %s948_s19   ;;  %s620_s18 = sphi %s691_s18, %s947_s18   ;;  %s616_s0 = sphi %s689_s0, %s946_s0   ;;  %s612_s17 = sphi %s687_s17, %s945_s17  }
  0x19   : > { %s356_s28 = sadd.s32 4294967294, %s652_s26   ;;  %s34_s29 = sadd.s32 1, %s644_s24 }
  0x1a   : > { %p35_p5 = scmp.ge.s32.totalorder %s34_s29, 2  ;;  %s37_s30 = sadd.s32 1, %s648_s25 }
  0x1b   : > { %s41_s4 = sld [smem:[#allocation3 + %s644_s24]]  ;;  %s48_s5 = sadd.s32 1, %s632_s21 }
  0x1c   : > { %s954_s29 = smov (%p35_p5, %s34_s29), 0  ;;  %s956_s30 = smov (!%p35_p5, %s37_s30), %s648_s25 }
  0x1d   : > { %929 = sst [smem:[#allocation15_spill]] %s954_s29  ;;  %p55_p6 = scmp.ne.s32.totalorder %s632_s21, %s628_s20 }
  0x1e   : > { %s42_s6 = sld [smem:[#allocation3 + %s954_s29]]  ;;  %p39_p7 = scmp.ge.s32.totalorder %s956_s30, 2 }
  0x1f   : > { %p61_p8 = scmp.ne.s32.totalorder %s628_s20, %s624_s19  ;;  %p56_p9 = scmp.eq.s32.totalorder %s652_s26, 0 }
  0x20   : > { %p62_p10 = scmp.eq.s32.totalorder %s355_s27, 0  ;;  %s958_s30 = smov (%p39_p7, %s956_s30), 0 }
  0x21   : > { %930 = sst [smem:[#allocation16_spill]] %s958_s30  ;;  %s43_s9 = ssub.s32 %s648_s25, %s958_s30 }
  0x22   : > { %p756_p11 = por %p62_p10, %p61_p8  ;;  %s99_s8 = sld [smem:[#allocation3 + %s644_s24]] }
  0x23   : > { %s100_s10 = sld [smem:[#allocation3 + %s954_s29]]  ;;  %s106_s12 = sadd.s32 1, %s620_s18 }
  0x24   : > { %s931_s7 = scalar_select %p756_p11, 1, 0 }
  0x25   : > { %s44_s11 = ssub.s32 %s41_s4, %s42_s6  ;;  %p116_p12 = scmp.ne.s32.totalorder %s620_s18, %s616_s0 }
  0x26   : > { %s45_s13 = sor.u32 %s44_s11, %s43_s9  ;;  %p117_p0 = scmp.eq.s32.totalorder %s355_s27, 3 }
  0x27   : > { %p46_p13 = scmp.eq.s32.totalorder %s45_s13, 0  ;;  %p122_p1 = scmp.ne.s32.totalorder %s616_s0, %s612_s17 }
  0x28   : > { %p123_p2 = scmp.eq.s32.totalorder %s356_s28, 3  ;;  %p772_p3 = por %p117_p0, %p116_p12 }
  0x29   : > { %s770_s14 = scalar_select %p46_p13, %s632_s21, %s48_s5  }
  0x2a   : > { %s102_s15 = ssub.s32 %s99_s8, %s100_s10  ;;  %p776_p4 = por %p123_p2, %p122_p1 }
  0x2b   : > { %932 = sst [smem:[#allocation17_spill]] %s770_s14  ;;  %s103_s19 = sor.u32 %s102_s15, %s43_s9 }
  0x2c   : > { %s933_s16 = scalar_select %p772_p3, 1, 0 }
  0x2d   : > { %s934_s4 = scalar_select %p776_p4, 1, 0 }
  0x2e   : > { %p104_p5 = scmp.eq.s32.totalorder %s103_s19, 0  ;;  %p57_p7 = por %p56_p9, %p55_p6 }
  0x2f   : > { %s143_s27 = sand.u32 1, %s632_s21   ;;  %p392_p8 = scmp.lt.s32.totalorder %s652_s26, 4 }
  0x30   : > { %s787_s28 = scalar_select %p104_p5, %s620_s18, %s106_s12  }
  0x31   : > { %s359_s5 = sshll.u32 %s143_s27, 5  ;;  %p791_p10 = pnand %p392_p8, %p57_p7 }
  0x32   : > { %s374_s6 = scalar_select %p57_p7, [#allocation3], [#allocation8] }
  0x33   : > { %s375_s8 = scalar_select %p57_p7, %s644_s24, 0 }
  0x34   : > { %s960_s6 = smov (!%p392_p8, %s374_s6), [#allocation10]  ;;  %s147_s11 = scalar_lea.vmem [#allocation4], %s359_s5 }
  0x35   : > { %s962_s8 = smov (!%p392_p8, %s375_s8), 0  ;;  %s157_s13 = sshll.u32 %s147_s11, 4  ;;  %s798_s13 = int_to_ptr.vmem [resolvable:$true] %s157_s13 }
  0x36   : > { %s148_s10 = sld [smem:[%s960_s6 + %s962_s8]]  ;;  %s372_s15 = sshll.u32 %s648_s25, 4 }
  0x37   : > { %p363_p12 = scmp.ge.s32.totalorder %s652_s26, 1  ;;  %p173_p6 = scmp.lt.s32.totalorder %s652_s26, 5 }
  0x38   : > { %s809_s5 = scalar_lea.sflag [#allocation5], %s143_s27  ;;  %p504_p0 = pneg %p791_p10 }
  0x39   : > { %p800_p9 = pnand %p363_p12, %p173_p6 }
  0x3b   : > { %s936_s12 = scalar_select %p800_p9, 1, 0 }
  0x3c   : > { %s154_s19 = sadd.s32 %s372_s15, %s148_s10  ;;  %s507_s10 = scalar_lea.hbm %s920_s1, 4096 }
  0x3d   : > { %s362_s30 = sshll.u32 %s154_s19, 7 }
  0x3e   : > { %s807_s14 = scalar_lea.hbm %s920_s1, %s362_s30 }
  0x3f   : > { %s502_s6 = scalar_lea.hbm %s807_s14, 512  ;;  %p508_p5 = scmp.lt.s32.totalorder %s807_s14, %s920_s1 }
  0x40   : > { %p503_p13 = scmp.ne.s32.totalorder %s807_s14, %s502_s6  ;;  %p509_p7 = scmp.lt.s32.totalorder %s507_s10, %s502_s6 }
  0x42   : > { %p505_p1 = pnand %p504_p0, %p503_p13  ;;  %p510_p8 = por %p509_p7, %p508_p5 }
  0x44   : > { %p506_p2 = pneg %p505_p1 }
  0x46   : > { %p511_p12 = pnand %p510_p8, %p506_p2 }
  0x48   : > { %514 = shalt.err (!%p511_p12)
}
  0x49   : > { %s515_s24 = scalar_lea.vmem %s798_s13, 512  ;;  %s655_s29 = smov [#allocation4]  }
  0x4a   : > { %p516_p6 = scmp.ne.s32.totalorder %s798_s13, %s515_s24  ;;  %s520_s30 = sshll.u32 %s655_s29, 4  ;;  %s521_s30 = int_to_ptr.vmem [resolvable:$false] %s520_s30 }
  0x4b   : > { %s522_s27 = scalar_lea.vmem %s521_s30, 1024  ;;  %p523_p1 = scmp.lt.s32.totalorder %s798_s13, %s521_s30 }
  0x4c   : > { %p518_p4 = pnand %p516_p6, %p504_p0  ;;  %p524_p3 = scmp.lt.s32.totalorder %s522_s27, %s515_s24 }
  0x4e   : > { %p519_p13 = pneg %p518_p4  ;;  %p525_p11 = por %p524_p3, %p523_p1 }
  0x50   : > { %p526_p9 = pnand %p525_p11, %p519_p13 }
  0x52   : > { %529 = shalt.err (!%p526_p9)
}
  0x53   : > { %s656_s6 = smov 512   ;;  %s657_s8 = smov 128  }
  0x54   : > { %s658_s11 = smov 8   ;;  %p937_p4 = scmp.ne.s32.totalorder %s936_s12, 0 }
  0x55   : > { %387 = dma.hbm_to_vmem [thread:$0]  (!%p791_p10), %s807_s14, 512, %s798_s13, %s809_s5, %s656_s6, %s657_s8, %s658_s11  }
  0x56   : > { %177 = sbr.rel (%p937_p4) target bundleno = 125 (0x7d), region = 28  ;;  %s179_s10 = sand.u32 (!%p937_p4), 1, %s628_s20  }
  0x57   : > { %s364_s15 = sshll.u32 (!%p937_p4), %s179_s10, 5  ;;  %s180_s19 = scalar_lea.sflag (!%p937_p4), [#allocation5], %s179_s10 }
  0x58   : > { %s183_s24 = scalar_lea.vmem (!%p937_p4), [#allocation4], %s364_s15  ;;  %p938_p11 = scmp.ne.s32.totalorder (!%p937_p4), %s931_s7, 0 }
  0x5b   : > { %603 = dma.done.wait (%p938_p11), %s180_s19, 512  }
  0x5c   : > { %605 = vsyncadd (%p938_p11), %s180_s19, 4294966784  ;;  %p939_p3 = scmp.ne.s32.totalorder %s933_s16, 0  ;;  %s210_s13 = sld [smem:[#allocation3 + %s636_s22]]  ;;  %v228_v0 = vlaneseq  ;;  %v217_v2 = vld [vmem:[%s183_s24] sm:$0xff]  ;;  %v218_v4 = vld [vmem:[%s183_s24 + $0x8] sm:$0xff]  ;;  %v659_v9 = vmov 0  }
  0x5d   : > { %s205_s12 = sand.u32 1, %s616_s0   ;;  %s373_s7 = sshll.u32 %s640_s23, 4  ;;  %v219_v5 = vld [vmem:[%s183_s24 + $0x10] sm:$0xff]  ;;  %v220_v6 = vld [vmem:[%s183_s24 + $0x18] sm:$0xff]  ;;  %v223_v8 = vmax.f32 %v217_v2, 0.0  ;;  %v224_v11 = vmax.f32 %v218_v4, 0.0 }
  0x5e   : > { %s378_s14 = scalar_select %p939_p3, [#allocation3], [#allocation9]  ;;  %v229_v1 = vshrl.u32 %v228_v0, 7  ;;  %v225_v12 = vmax.f32 %v219_v5, 0.0  ;;  %v226_v13 = vmax.f32 %v220_v6, 0.0 }
  0x5f   : > { %s379_s9 = scalar_select %p939_p3, %s636_s22, 0 }
  0x60   : > { %s365_s29 = sshll.u32 %s205_s12, 5  ;;  %v230_v3 = vsub.s32 0, %v229_v1  ;;  %s859_s24 = scalar_lea.sflag [#allocation6], %s205_s12 }
  0x61   : > { %s249_s5 = sld [smem:[%s378_s14 + %s379_s9]]  ;;  %s207_s22 = scalar_lea.vmem [#allocation7], %s365_s29 }
  0x62   : > { %p211_p10 = scmp.lt.s32.totalorder %s210_s13, 3  ;;  %s258_s11 = sshll.u32 %s207_s22, 4  ;;  %s850_s11 = int_to_ptr.vmem [resolvable:$true] %s258_s11 }
  0x63   : > { %s530_s14 = scalar_lea.vmem %s850_s11, 512  ;;  %s660_s9 = smov [#allocation7]  }
  0x64   : > { %s964_s13 = smov (!%p211_p10, %s210_s13), 3  ;;  %p531_p9 = scmp.ne.s32.totalorder %s850_s11, %s530_s14 }
  0x65   : > { %s213_s6 = scalar_lea.vmem %s921_s2, %s964_s13  ;;  %s534_s13 = sshll.u32 %s660_s9, 4  ;;  %s535_s13 = int_to_ptr.vmem [resolvable:$false] %s534_s13 }
  0x66   : > { %v221_v7 = vld [vmem:[%s213_s6] sm:$0x1]  ;;  %p532_p0 = pnand %p531_p9, %p939_p3  ;;  %p537_p5 = scmp.lt.s32.totalorder %s850_s11, %s535_s13 }
  0x67   : > { %s255_s8 = sadd.s32 %s373_s7, %s249_s5  ;;  %vm222_vm0 = vcmp.gt.f32.partialorder %v221_v7, 0.0  ;;  %s536_s5 = scalar_lea.vmem %s535_s13, 1024 }
  0x68   : > { %v227_v10 = vsel %vm222_vm0, 1, %v659_v9  ;;  %s369_s23 = sshll.u32 %s255_s8, 7  ;;  %p533_p2 = pneg %p532_p0 }
  0x69   : > { %v231_v14 = vrot.slane %v227_v10, %v230_v3  ;;  %s855_s19 = scalar_lea.hbm %s922_s3, %s369_s23  ;;  %p538_p7 = scmp.lt.s32.totalorder %s536_s5, %s530_s14 }
  0x6b   : > { %vm232_vm1 = vcmp.eq.s32.totalorder %v231_v14, 1  ;;  %p539_p8 = por %p538_p7, %p537_p5 }
  0x6c   : > { %v233_v15 = vsel %vm232_vm1, %v223_v8, %v217_v2  ;;  %v234_v16 = vsel %vm232_vm1, %v224_v11, %v218_v4  ;;  %v235_v17 = vsel %vm232_vm1, %v225_v12, %v219_v5  ;;  %v236_v18 = vsel %vm232_vm1, %v226_v13, %v220_v6 }
  0x6d   : > { %237 = vst [vmem:[%s207_s22] sm:$0xff] %v233_v15  ;;  %238 = vst [vmem:[%s207_s22 + $0x8] sm:$0xff] %v234_v16  ;;  %p540_p12 = pnand %p539_p8, %p533_p2 }
  0x6e   : > { %239 = vst [vmem:[%s207_s22 + $0x10] sm:$0xff] %v235_v17  ;;  %240 = vst [vmem:[%s207_s22 + $0x18] sm:$0xff] %v236_v18 }
  0x6f   : > { %543 = shalt.err (!%p540_p12)
}
  0x70   : > { %s544_s12 = scalar_lea.hbm %s855_s19, 512  ;;  %s548_s30 = scalar_lea.hbm %s922_s3, 4096 }
  0x71   : > { %p545_p6 = scmp.ne.s32.totalorder %s855_s19, %s544_s12  ;;  %p549_p4 = scmp.lt.s32.totalorder %s855_s19, %s922_s3 }
  0x72   : > { %p550_p11 = scmp.lt.s32.totalorder %s548_s30, %s544_s12 }
  0x73   : > { %p546_p13 = pnand %p545_p6, %p939_p3 }
  0x74   : > { %p551_p10 = por %p550_p11, %p549_p4 }
  0x75   : > { %p547_p1 = pneg %p546_p13 }
  0x77   : > { %p552_p9 = pnand %p551_p10, %p547_p1 }
  0x79   : > { %555 = shalt.err (!%p552_p9)
}
  0x7a   : > { %s661_s8 = smov 128   ;;  %s662_s22 = smov 512  }
  0x7b   : > { %s663_s23 = smov 8  }
  0x7c   : > { %380 = dma.vmem_to_hbm [thread:$0]  (%p939_p3), %s850_s11, 512, %s855_s19, %s859_s24, %s661_s8, %s662_s22, %s663_s23  }
  0x7d PF: > { %p393_p0 = scmp.ge.s32.totalorder %s652_s26, 2  ;;  %s273_s10 = sand.u32 1, %s612_s17  }
  0x7e   : > { %p940_p2 = scmp.ne.s32.totalorder %s934_s4, 0  ;;  %s274_s15 = scalar_lea.sflag [#allocation6], %s273_s10 }
  0x80   : > { %p389_p5 = pnand %p393_p0, %p940_p2 }
  0x82   : > { %p390_p7 = pneg %p389_p5 }
  0x84   : > { %607 = dma.done.wait (%p390_p7), %s274_s15, 512  }
  0x85   : > { %609 = vsyncadd (%p390_p7), %s274_s15, 4294966784  ;;  %s25_s26 = sadd.s32 1, %s652_s26   ;;  %s941_s16 = sld [smem:[#allocation17_spill]] }
  0x86   : > { %p22_p8 = scmp.ge.s32.totalorder %s25_s26, 6   ;;  %s942_s22 = sld [smem:[#allocation14_spill]] }
  0x87   : > { %s943_s24 = sld [smem:[#allocation15_spill]]  ;;  %s945_s17 = smov %s616_s0 }
  0x88   : > { %s944_s11 = sld [smem:[#allocation16_spill]]  ;;  %s946_s0 = smov %s620_s18 }
  0x89   : > { %s947_s18 = smov %s787_s28  ;;  %s948_s19 = smov %s628_s20 }
  0x8a   : > { %s949_s20 = smov %s632_s21  ;;  %s951_s23 = smov %s648_s25 }
  0x8b   : > { %s950_s21 = smov %s941_s16  ;;  %24 = sbr.rel (!%p22_p8) target bundleno = 24 (0x18), region = 76 }
  0x8e   : > { %s952_s25 = smov %s944_s11 }
  0x90   :  { %279 = vsyncpa [#allocation5], 1 }
  0x91   :  { %281 = vsyncpa [#allocation5 + $0x1], 1 }
  0x92   :  { %282 = vsyncpa [#allocation6], 1 }
  0x93   :  { %284 = vsyncpa [#allocation6 + $0x1], 1 }

</bundles_post_ra>
